<compile_context>
chip_gen: v5e
topology: v5e:2x2
jax: 0.10.0
libtpu: 0.0.40
codegen_flags: <defaults>
</compile_context>

<pallas_src>
import jax
import jax.numpy as jnp
from jax.experimental import pallas as pl
from jax.experimental.pallas import tpu as pltpu

NUM_OPS = 4  # identity, zero, linear, linear_relu


def _make_search_cell_kernel(L, num_ops):
    def kernel(mix_ref, x_ref, wl_ref, bl_ref, wr_ref, br_ref, o_ref):
        # Activation stays in registers across the whole cell.
        h = x_ref[...].astype(jnp.float32)

        # Statically unrolled layer loop (L is small, e.g. 9).
        for i in range(L):
            w_id = mix_ref[i * num_ops + 0]
            # mix_ref[i*num_ops + 1] is the 'zero' op -> contributes nothing.
            w_lin = mix_ref[i * num_ops + 2]
            w_lrl = mix_ref[i * num_ops + 3]

            # Two separate (D, D) MXU matmuls: outputs are lane-aligned with h,
            # so no cross-lane realignment on the serial dependency chain.
            y_lin = jnp.dot(h, wl_ref[i], preferred_element_type=jnp.float32)
            y_lin = y_lin + bl_ref[i]
            y_lrl = jnp.dot(h, wr_ref[i], preferred_element_type=jnp.float32)
            y_lrl = jnp.maximum(y_lrl + br_ref[i], 0.0)

            # Weighted mix of candidate ops; keep f32 on the VPU (v5e has no
            # bf16 VALU).  Scaling after ReLU is valid because softmax weights
            # are non-negative.
            h = w_id * h + w_lin * y_lin + w_lrl * y_lrl

        o_ref[...] = h.astype(o_ref.dtype)  # single store at the end

    return kernel


def search_cell_forward(x, alphas, W_lin, b_lin, W_lrl, b_lrl):
    B, D = x.shape
    L = alphas.shape[0]

    # Tiny glue: softmax over the (L, NUM_OPS) architecture parameters,
    # flattened to 1D f32 for un-padded SMEM residence.
    mix = jax.nn.softmax(alphas.astype(jnp.float32), axis=1).reshape(-1)

    # Batch-tile grid axis ("parallel" -> shards across v7x's 2 TensorCores at
    # realistic B; degenerates to a single step at the tiny test shape).
    if B % 256 == 0:
        bt = 256
    elif B % 128 == 0:
        bt = 128
    else:
        bt = B
    grid = (B // bt,)

    kernel = _make_search_cell_kernel(L, NUM_OPS)

    # TODO(synk): at D >= ~512 cast matmul operands (h and W) to bf16 while
    # keeping preferred_element_type=f32 and the mixing math in f32.
    return pl.pallas_call(
        kernel,
        out_shape=jax.ShapeDtypeStruct((B, D), x.dtype),
        grid=grid,
        in_specs=[
            pl.BlockSpec(memory_space=pltpu.MemorySpace.SMEM),   # mix (L*NUM_OPS,)
            pl.BlockSpec((bt, D), lambda b: (b, 0)),             # x      (B, D)
            pl.BlockSpec((L, D, D), lambda b: (0, 0, 0)),        # W_lin  (L, D, D)
            pl.BlockSpec((L, D), lambda b: (0, 0)),              # b_lin  (L, D)
            pl.BlockSpec((L, D, D), lambda b: (0, 0, 0)),        # W_lrl  (L, D, D)
            pl.BlockSpec((L, D), lambda b: (0, 0)),              # b_lrl  (L, D)
        ],
        out_specs=pl.BlockSpec((bt, D), lambda b: (b, 0)),
        compiler_params=pltpu.CompilerParams(
            dimension_semantics=("parallel",)),
    )(mix, x, W_lin, b_lin, W_lrl, b_lrl)


def search_cell_ref(x, alphas, W_lin, b_lin, W_lrl, b_lrl):
    """Pure-JAX reference mirroring SearchCell.forward."""
    weights = jax.nn.softmax(alphas.astype(jnp.float32), axis=1)
    h = x.astype(jnp.float32)
    for i in range(alphas.shape[0]):
        y_lin = h @ W_lin[i].astype(jnp.float32) + b_lin[i]
        y_lrl = jnp.maximum(h @ W_lrl[i].astype(jnp.float32) + b_lrl[i], 0.0)
        h = (weights[i, 0] * h            # identity
             + weights[i, 1] * 0.0        # zero
             + weights[i, 2] * y_lin      # linear
             + weights[i, 3] * y_lrl)     # linear_relu
    return h.astype(x.dtype)


if __name__ == "__main__":
    B, D, L = 2, 32, 9   # batch=2, dim=hidden_dim=out_dim=32, num_layers=9 (default)

    key = jax.random.PRNGKey(0)
    k_x, k_a, k_wl, k_bl, k_wr, k_br = jax.random.split(key, 6)

    x = jax.random.normal(k_x, (B, D), dtype=jnp.float32)
    # Module init is torch.zeros; use a small deterministic perturbation so the
    # softmax mixing is non-trivial while keeping the same forward semantics.
    alphas = 0.1 * jax.random.normal(k_a, (L, NUM_OPS), dtype=jnp.float32)
    scale = 1.0 / jnp.sqrt(jnp.float32(D))
    W_lin = scale * jax.random.normal(k_wl, (L, D, D), dtype=jnp.float32)
    b_lin = 0.01 * jax.random.normal(k_bl, (L, D), dtype=jnp.float32)
    W_lrl = scale * jax.random.normal(k_wr, (L, D, D), dtype=jnp.float32)
    b_lrl = 0.01 * jax.random.normal(k_br, (L, D), dtype=jnp.float32)

    out = jax.block_until_ready(
        search_cell_forward(x, alphas, W_lin, b_lin, W_lrl, b_lrl))
    ref = search_cell_ref(x, alphas, W_lin, b_lin, W_lrl, b_lrl)

    assert out.shape == (B, D)
    assert jnp.allclose(out, ref, atol=1e-4, rtol=1e-4), (
        f"max abs err = {jnp.max(jnp.abs(out - ref))}")
    print("KERNEL_OK")
</pallas_src>

<mosaic_0001>
module attributes {stable_mosaic.version = 11 : i64} {
  func.func @kernel(%arg0: i32, %arg1: memref<36xf32, #tpu.memory_space<smem>>, %arg2: memref<2x32xf32, #tpu.memory_space<vmem>>, %arg3: memref<9x32x32xf32, #tpu.memory_space<vmem>>, %arg4: memref<9x32xf32, #tpu.memory_space<vmem>>, %arg5: memref<9x32x32xf32, #tpu.memory_space<vmem>>, %arg6: memref<9x32xf32, #tpu.memory_space<vmem>>, %arg7: memref<2x32xf32, #tpu.memory_space<vmem>>) attributes {dimension_semantics = [#tpu.dimension_semantics<parallel>], iteration_bounds = array<i64: 1>, scalar_prefetch = 0 : i64, scratch_operands = 0 : i64, tpu.core_type = #tpu.core_type<tc>, window_params = [{transform_indices = @transform_0, window_bounds = array<i64: 36>}, {transform_indices = @transform_1, window_bounds = array<i64: 2, 32>}, {pipeline_mode = #tpu.pipeline_mode<synchronous>, transform_indices = @transform_2, window_bounds = array<i64: 9, 32, 32>}, {pipeline_mode = #tpu.pipeline_mode<synchronous>, transform_indices = @transform_3, window_bounds = array<i64: 9, 32>}, {pipeline_mode = #tpu.pipeline_mode<synchronous>, transform_indices = @transform_4, window_bounds = array<i64: 9, 32, 32>}, {pipeline_mode = #tpu.pipeline_mode<synchronous>, transform_indices = @transform_5, window_bounds = array<i64: 9, 32>}, {transform_indices = @transform_6, window_bounds = array<i64: 2, 32>}]} {
    %c0 = arith.constant 0 : index
    %c0_0 = arith.constant 0 : index
    %0 = vector.load %arg2[%c0, %c0_0] : memref<2x32xf32, #tpu.memory_space<vmem>>, vector<2x32xf32>
    %c0_1 = arith.constant 0 : index
    %1 = memref.load %arg1[%c0_1] : memref<36xf32, #tpu.memory_space<smem>>
    %c2 = arith.constant 2 : index
    %2 = memref.load %arg1[%c2] : memref<36xf32, #tpu.memory_space<smem>>
    %c3 = arith.constant 3 : index
    %3 = memref.load %arg1[%c3] : memref<36xf32, #tpu.memory_space<smem>>
    %c0_2 = arith.constant 0 : index
    %c0_3 = arith.constant 0 : index
    %c0_4 = arith.constant 0 : index
    %4 = vector.load %arg3[%c0_2, %c0_3, %c0_4] : memref<9x32x32xf32, #tpu.memory_space<vmem>>, vector<1x32x32xf32>
    %5 = vector.shape_cast %4 : vector<1x32x32xf32> to vector<32x32xf32>
    %cst = arith.constant dense<0.000000e+00> : vector<2x32xf32>
    %6 = tpu.matmul %0, %5, %cst {dimension_numbers = #tpu.dot_dimension_numbers<[1], [0], [0], [1], [0, 0, 1, 1], [], []>} : vector<2x32xf32>, vector<32x32xf32>, vector<2x32xf32> -> vector<2x32xf32>
    %c0_5 = arith.constant 0 : index
    %c0_6 = arith.constant 0 : index
    %7 = vector.load %arg4[%c0_5, %c0_6] : memref<9x32xf32, #tpu.memory_space<vmem>>, vector<1x32xf32>
    %8 = vector.shape_cast %7 : vector<1x32xf32> to vector<32xf32>
    %9 = vector.shape_cast %8 : vector<32xf32> to vector<1x32xf32>
    %10 = vector.broadcast %9 : vector<1x32xf32> to vector<2x32xf32>
    %11 = arith.addf %6, %10 : vector<2x32xf32>
    %c0_7 = arith.constant 0 : index
    %c0_8 = arith.constant 0 : index
    %c0_9 = arith.constant 0 : index
    %12 = vector.load %arg5[%c0_7, %c0_8, %c0_9] : memref<9x32x32xf32, #tpu.memory_space<vmem>>, vector<1x32x32xf32>
    %13 = vector.shape_cast %12 : vector<1x32x32xf32> to vector<32x32xf32>
    %cst_10 = arith.constant dense<0.000000e+00> : vector<2x32xf32>
    %14 = tpu.matmul %0, %13, %cst_10 {dimension_numbers = #tpu.dot_dimension_numbers<[1], [0], [0], [1], [0, 0, 1, 1], [], []>} : vector<2x32xf32>, vector<32x32xf32>, vector<2x32xf32> -> vector<2x32xf32>
    %c0_11 = arith.constant 0 : index
    %c0_12 = arith.constant 0 : index
    %15 = vector.load %arg6[%c0_11, %c0_12] : memref<9x32xf32, #tpu.memory_space<vmem>>, vector<1x32xf32>
    %16 = vector.shape_cast %15 : vector<1x32xf32> to vector<32xf32>
    %17 = vector.shape_cast %16 : vector<32xf32> to vector<1x32xf32>
    %18 = vector.broadcast %17 : vector<1x32xf32> to vector<2x32xf32>
    %19 = arith.addf %14, %18 : vector<2x32xf32>
    %cst_13 = arith.constant 0.000000e+00 : f32
    %20 = vector.broadcast %cst_13 : f32 to vector<2x32xf32>
    %21 = arith.maximumf %19, %20 : vector<2x32xf32>
    %22 = vector.broadcast %1 : f32 to vector<2x32xf32>
    %23 = arith.mulf %22, %0 : vector<2x32xf32>
    %24 = vector.broadcast %2 : f32 to vector<2x32xf32>
    %25 = arith.mulf %24, %11 : vector<2x32xf32>
    %26 = arith.addf %23, %25 : vector<2x32xf32>
    %27 = vector.broadcast %3 : f32 to vector<2x32xf32>
    %28 = arith.mulf %27, %21 : vector<2x32xf32>
    %29 = arith.addf %26, %28 : vector<2x32xf32>
    %c4 = arith.constant 4 : index
    %30 = memref.load %arg1[%c4] : memref<36xf32, #tpu.memory_space<smem>>
    %c6 = arith.constant 6 : index
    %31 = memref.load %arg1[%c6] : memref<36xf32, #tpu.memory_space<smem>>
    %c7 = arith.constant 7 : index
    %32 = memref.load %arg1[%c7] : memref<36xf32, #tpu.memory_space<smem>>
    %c1 = arith.constant 1 : index
    %c0_14 = arith.constant 0 : index
    %c0_15 = arith.constant 0 : index
    %33 = vector.load %arg3[%c1, %c0_14, %c0_15] : memref<9x32x32xf32, #tpu.memory_space<vmem>>, vector<1x32x32xf32>
    %34 = vector.shape_cast %33 : vector<1x32x32xf32> to vector<32x32xf32>
    %cst_16 = arith.constant dense<0.000000e+00> : vector<2x32xf32>
    %35 = tpu.matmul %29, %34, %cst_16 {dimension_numbers = #tpu.dot_dimension_numbers<[1], [0], [0], [1], [0, 0, 1, 1], [], []>} : vector<2x32xf32>, vector<32x32xf32>, vector<2x32xf32> -> vector<2x32xf32>
    %c1_17 = arith.constant 1 : index
    %c0_18 = arith.constant 0 : index
    %36 = vector.load %arg4[%c1_17, %c0_18] : memref<9x32xf32, #tpu.memory_space<vmem>>, vector<1x32xf32>
    %37 = vector.shape_cast %36 : vector<1x32xf32> to vector<32xf32>
    %38 = vector.shape_cast %37 : vector<32xf32> to vector<1x32xf32>
    %39 = vector.broadcast %38 : vector<1x32xf32> to vector<2x32xf32>
    %40 = arith.addf %35, %39 : vector<2x32xf32>
    %c1_19 = arith.constant 1 : index
    %c0_20 = arith.constant 0 : index
    %c0_21 = arith.constant 0 : index
    %41 = vector.load %arg5[%c1_19, %c0_20, %c0_21] : memref<9x32x32xf32, #tpu.memory_space<vmem>>, vector<1x32x32xf32>
    %42 = vector.shape_cast %41 : vector<1x32x32xf32> to vector<32x32xf32>
    %cst_22 = arith.constant dense<0.000000e+00> : vector<2x32xf32>
    %43 = tpu.matmul %29, %42, %cst_22 {dimension_numbers = #tpu.dot_dimension_numbers<[1], [0], [0], [1], [0, 0, 1, 1], [], []>} : vector<2x32xf32>, vector<32x32xf32>, vector<2x32xf32> -> vector<2x32xf32>
    %c1_23 = arith.constant 1 : index
    %c0_24 = arith.constant 0 : index
    %44 = vector.load %arg6[%c1_23, %c0_24] : memref<9x32xf32, #tpu.memory_space<vmem>>, vector<1x32xf32>
    %45 = vector.shape_cast %44 : vector<1x32xf32> to vector<32xf32>
    %46 = vector.shape_cast %45 : vector<32xf32> to vector<1x32xf32>
    %47 = vector.broadcast %46 : vector<1x32xf32> to vector<2x32xf32>
    %48 = arith.addf %43, %47 : vector<2x32xf32>
    %cst_25 = arith.constant 0.000000e+00 : f32
    %49 = vector.broadcast %cst_25 : f32 to vector<2x32xf32>
    %50 = arith.maximumf %48, %49 : vector<2x32xf32>
    %51 = vector.broadcast %30 : f32 to vector<2x32xf32>
    %52 = arith.mulf %51, %29 : vector<2x32xf32>
    %53 = vector.broadcast %31 : f32 to vector<2x32xf32>
    %54 = arith.mulf %53, %40 : vector<2x32xf32>
    %55 = arith.addf %52, %54 : vector<2x32xf32>
    %56 = vector.broadcast %32 : f32 to vector<2x32xf32>
    %57 = arith.mulf %56, %50 : vector<2x32xf32>
    %58 = arith.addf %55, %57 : vector<2x32xf32>
    %c8 = arith.constant 8 : index
    %59 = memref.load %arg1[%c8] : memref<36xf32, #tpu.memory_space<smem>>
    %c10 = arith.constant 10 : index
    %60 = memref.load %arg1[%c10] : memref<36xf32, #tpu.memory_space<smem>>
    %c11 = arith.constant 11 : index
    %61 = memref.load %arg1[%c11] : memref<36xf32, #tpu.memory_space<smem>>
    %c2_26 = arith.constant 2 : index
    %c0_27 = arith.constant 0 : index
    %c0_28 = arith.constant 0 : index
    %62 = vector.load %arg3[%c2_26, %c0_27, %c0_28] : memref<9x32x32xf32, #tpu.memory_space<vmem>>, vector<1x32x32xf32>
    %63 = vector.shape_cast %62 : vector<1x32x32xf32> to vector<32x32xf32>
    %cst_29 = arith.constant dense<0.000000e+00> : vector<2x32xf32>
    %64 = tpu.matmul %58, %63, %cst_29 {dimension_numbers = #tpu.dot_dimension_numbers<[1], [0], [0], [1], [0, 0, 1, 1], [], []>} : vector<2x32xf32>, vector<32x32xf32>, vector<2x32xf32> -> vector<2x32xf32>
    %c2_30 = arith.constant 2 : index
    %c0_31 = arith.constant 0 : index
    %65 = vector.load %arg4[%c2_30, %c0_31] : memref<9x32xf32, #tpu.memory_space<vmem>>, vector<1x32xf32>
    %66 = vector.shape_cast %65 : vector<1x32xf32> to vector<32xf32>
    %67 = vector.shape_cast %66 : vector<32xf32> to vector<1x32xf32>
    %68 = vector.broadcast %67 : vector<1x32xf32> to vector<2x32xf32>
    %69 = arith.addf %64, %68 : vector<2x32xf32>
    %c2_32 = arith.constant 2 : index
    %c0_33 = arith.constant 0 : index
    %c0_34 = arith.constant 0 : index
    %70 = vector.load %arg5[%c2_32, %c0_33, %c0_34] : memref<9x32x32xf32, #tpu.memory_space<vmem>>, vector<1x32x32xf32>
    %71 = vector.shape_cast %70 : vector<1x32x32xf32> to vector<32x32xf32>
    %cst_35 = arith.constant dense<0.000000e+00> : vector<2x32xf32>
    %72 = tpu.matmul %58, %71, %cst_35 {dimension_numbers = #tpu.dot_dimension_numbers<[1], [0], [0], [1], [0, 0, 1, 1], [], []>} : vector<2x32xf32>, vector<32x32xf32>, vector<2x32xf32> -> vector<2x32xf32>
    %c2_36 = arith.constant 2 : index
    %c0_37 = arith.constant 0 : index
    %73 = vector.load %arg6[%c2_36, %c0_37] : memref<9x32xf32, #tpu.memory_space<vmem>>, vector<1x32xf32>
    %74 = vector.shape_cast %73 : vector<1x32xf32> to vector<32xf32>
    %75 = vector.shape_cast %74 : vector<32xf32> to vector<1x32xf32>
    %76 = vector.broadcast %75 : vector<1x32xf32> to vector<2x32xf32>
    %77 = arith.addf %72, %76 : vector<2x32xf32>
    %cst_38 = arith.constant 0.000000e+00 : f32
    %78 = vector.broadcast %cst_38 : f32 to vector<2x32xf32>
    %79 = arith.maximumf %77, %78 : vector<2x32xf32>
    %80 = vector.broadcast %59 : f32 to vector<2x32xf32>
    %81 = arith.mulf %80, %58 : vector<2x32xf32>
    %82 = vector.broadcast %60 : f32 to vector<2x32xf32>
    %83 = arith.mulf %82, %69 : vector<2x32xf32>
    %84 = arith.addf %81, %83 : vector<2x32xf32>
    %85 = vector.broadcast %61 : f32 to vector<2x32xf32>
    %86 = arith.mulf %85, %79 : vector<2x32xf32>
    %87 = arith.addf %84, %86 : vector<2x32xf32>
    %c12 = arith.constant 12 : index
    %88 = memref.load %arg1[%c12] : memref<36xf32, #tpu.memory_space<smem>>
    %c14 = arith.constant 14 : index
    %89 = memref.load %arg1[%c14] : memref<36xf32, #tpu.memory_space<smem>>
    %c15 = arith.constant 15 : index
    %90 = memref.load %arg1[%c15] : memref<36xf32, #tpu.memory_space<smem>>
    %c3_39 = arith.constant 3 : index
    %c0_40 = arith.constant 0 : index
    %c0_41 = arith.constant 0 : index
    %91 = vector.load %arg3[%c3_39, %c0_40, %c0_41] : memref<9x32x32xf32, #tpu.memory_space<vmem>>, vector<1x32x32xf32>
    %92 = vector.shape_cast %91 : vector<1x32x32xf32> to vector<32x32xf32>
    %cst_42 = arith.constant dense<0.000000e+00> : vector<2x32xf32>
    %93 = tpu.matmul %87, %92, %cst_42 {dimension_numbers = #tpu.dot_dimension_numbers<[1], [0], [0], [1], [0, 0, 1, 1], [], []>} : vector<2x32xf32>, vector<32x32xf32>, vector<2x32xf32> -> vector<2x32xf32>
    %c3_43 = arith.constant 3 : index
    %c0_44 = arith.constant 0 : index
    %94 = vector.load %arg4[%c3_43, %c0_44] : memref<9x32xf32, #tpu.memory_space<vmem>>, vector<1x32xf32>
    %95 = vector.shape_cast %94 : vector<1x32xf32> to vector<32xf32>
    %96 = vector.shape_cast %95 : vector<32xf32> to vector<1x32xf32>
    %97 = vector.broadcast %96 : vector<1x32xf32> to vector<2x32xf32>
    %98 = arith.addf %93, %97 : vector<2x32xf32>
    %c3_45 = arith.constant 3 : index
    %c0_46 = arith.constant 0 : index
    %c0_47 = arith.constant 0 : index
    %99 = vector.load %arg5[%c3_45, %c0_46, %c0_47] : memref<9x32x32xf32, #tpu.memory_space<vmem>>, vector<1x32x32xf32>
    %100 = vector.shape_cast %99 : vector<1x32x32xf32> to vector<32x32xf32>
    %cst_48 = arith.constant dense<0.000000e+00> : vector<2x32xf32>
    %101 = tpu.matmul %87, %100, %cst_48 {dimension_numbers = #tpu.dot_dimension_numbers<[1], [0], [0], [1], [0, 0, 1, 1], [], []>} : vector<2x32xf32>, vector<32x32xf32>, vector<2x32xf32> -> vector<2x32xf32>
    %c3_49 = arith.constant 3 : index
    %c0_50 = arith.constant 0 : index
    %102 = vector.load %arg6[%c3_49, %c0_50] : memref<9x32xf32, #tpu.memory_space<vmem>>, vector<1x32xf32>
    %103 = vector.shape_cast %102 : vector<1x32xf32> to vector<32xf32>
    %104 = vector.shape_cast %103 : vector<32xf32> to vector<1x32xf32>
    %105 = vector.broadcast %104 : vector<1x32xf32> to vector<2x32xf32>
    %106 = arith.addf %101, %105 : vector<2x32xf32>
    %cst_51 = arith.constant 0.000000e+00 : f32
    %107 = vector.broadcast %cst_51 : f32 to vector<2x32xf32>
    %108 = arith.maximumf %106, %107 : vector<2x32xf32>
    %109 = vector.broadcast %88 : f32 to vector<2x32xf32>
    %110 = arith.mulf %109, %87 : vector<2x32xf32>
    %111 = vector.broadcast %89 : f32 to vector<2x32xf32>
    %112 = arith.mulf %111, %98 : vector<2x32xf32>
    %113 = arith.addf %110, %112 : vector<2x32xf32>
    %114 = vector.broadcast %90 : f32 to vector<2x32xf32>
    %115 = arith.mulf %114, %108 : vector<2x32xf32>
    %116 = arith.addf %113, %115 : vector<2x32xf32>
    %c16 = arith.constant 16 : index
    %117 = memref.load %arg1[%c16] : memref<36xf32, #tpu.memory_space<smem>>
    %c18 = arith.constant 18 : index
    %118 = memref.load %arg1[%c18] : memref<36xf32, #tpu.memory_space<smem>>
    %c19 = arith.constant 19 : index
    %119 = memref.load %arg1[%c19] : memref<36xf32, #tpu.memory_space<smem>>
    %c4_52 = arith.constant 4 : index
    %c0_53 = arith.constant 0 : index
    %c0_54 = arith.constant 0 : index
    %120 = vector.load %arg3[%c4_52, %c0_53, %c0_54] : memref<9x32x32xf32, #tpu.memory_space<vmem>>, vector<1x32x32xf32>
    %121 = vector.shape_cast %120 : vector<1x32x32xf32> to vector<32x32xf32>
    %cst_55 = arith.constant dense<0.000000e+00> : vector<2x32xf32>
    %122 = tpu.matmul %116, %121, %cst_55 {dimension_numbers = #tpu.dot_dimension_numbers<[1], [0], [0], [1], [0, 0, 1, 1], [], []>} : vector<2x32xf32>, vector<32x32xf32>, vector<2x32xf32> -> vector<2x32xf32>
    %c4_56 = arith.constant 4 : index
    %c0_57 = arith.constant 0 : index
    %123 = vector.load %arg4[%c4_56, %c0_57] : memref<9x32xf32, #tpu.memory_space<vmem>>, vector<1x32xf32>
    %124 = vector.shape_cast %123 : vector<1x32xf32> to vector<32xf32>
    %125 = vector.shape_cast %124 : vector<32xf32> to vector<1x32xf32>
    %126 = vector.broadcast %125 : vector<1x32xf32> to vector<2x32xf32>
    %127 = arith.addf %122, %126 : vector<2x32xf32>
    %c4_58 = arith.constant 4 : index
    %c0_59 = arith.constant 0 : index
    %c0_60 = arith.constant 0 : index
    %128 = vector.load %arg5[%c4_58, %c0_59, %c0_60] : memref<9x32x32xf32, #tpu.memory_space<vmem>>, vector<1x32x32xf32>
    %129 = vector.shape_cast %128 : vector<1x32x32xf32> to vector<32x32xf32>
    %cst_61 = arith.constant dense<0.000000e+00> : vector<2x32xf32>
    %130 = tpu.matmul %116, %129, %cst_61 {dimension_numbers = #tpu.dot_dimension_numbers<[1], [0], [0], [1], [0, 0, 1, 1], [], []>} : vector<2x32xf32>, vector<32x32xf32>, vector<2x32xf32> -> vector<2x32xf32>
    %c4_62 = arith.constant 4 : index
    %c0_63 = arith.constant 0 : index
    %131 = vector.load %arg6[%c4_62, %c0_63] : memref<9x32xf32, #tpu.memory_space<vmem>>, vector<1x32xf32>
    %132 = vector.shape_cast %131 : vector<1x32xf32> to vector<32xf32>
    %133 = vector.shape_cast %132 : vector<32xf32> to vector<1x32xf32>
    %134 = vector.broadcast %133 : vector<1x32xf32> to vector<2x32xf32>
    %135 = arith.addf %130, %134 : vector<2x32xf32>
    %cst_64 = arith.constant 0.000000e+00 : f32
    %136 = vector.broadcast %cst_64 : f32 to vector<2x32xf32>
    %137 = arith.maximumf %135, %136 : vector<2x32xf32>
    %138 = vector.broadcast %117 : f32 to vector<2x32xf32>
    %139 = arith.mulf %138, %116 : vector<2x32xf32>
    %140 = vector.broadcast %118 : f32 to vector<2x32xf32>
    %141 = arith.mulf %140, %127 : vector<2x32xf32>
    %142 = arith.addf %139, %141 : vector<2x32xf32>
    %143 = vector.broadcast %119 : f32 to vector<2x32xf32>
    %144 = arith.mulf %143, %137 : vector<2x32xf32>
    %145 = arith.addf %142, %144 : vector<2x32xf32>
    %c20 = arith.constant 20 : index
    %146 = memref.load %arg1[%c20] : memref<36xf32, #tpu.memory_space<smem>>
    %c22 = arith.constant 22 : index
    %147 = memref.load %arg1[%c22] : memref<36xf32, #tpu.memory_space<smem>>
    %c23 = arith.constant 23 : index
    %148 = memref.load %arg1[%c23] : memref<36xf32, #tpu.memory_space<smem>>
    %c5 = arith.constant 5 : index
    %c0_65 = arith.constant 0 : index
    %c0_66 = arith.constant 0 : index
    %149 = vector.load %arg3[%c5, %c0_65, %c0_66] : memref<9x32x32xf32, #tpu.memory_space<vmem>>, vector<1x32x32xf32>
    %150 = vector.shape_cast %149 : vector<1x32x32xf32> to vector<32x32xf32>
    %cst_67 = arith.constant dense<0.000000e+00> : vector<2x32xf32>
    %151 = tpu.matmul %145, %150, %cst_67 {dimension_numbers = #tpu.dot_dimension_numbers<[1], [0], [0], [1], [0, 0, 1, 1], [], []>} : vector<2x32xf32>, vector<32x32xf32>, vector<2x32xf32> -> vector<2x32xf32>
    %c5_68 = arith.constant 5 : index
    %c0_69 = arith.constant 0 : index
    %152 = vector.load %arg4[%c5_68, %c0_69] : memref<9x32xf32, #tpu.memory_space<vmem>>, vector<1x32xf32>
    %153 = vector.shape_cast %152 : vector<1x32xf32> to vector<32xf32>
    %154 = vector.shape_cast %153 : vector<32xf32> to vector<1x32xf32>
    %155 = vector.broadcast %154 : vector<1x32xf32> to vector<2x32xf32>
    %156 = arith.addf %151, %155 : vector<2x32xf32>
    %c5_70 = arith.constant 5 : index
    %c0_71 = arith.constant 0 : index
    %c0_72 = arith.constant 0 : index
    %157 = vector.load %arg5[%c5_70, %c0_71, %c0_72] : memref<9x32x32xf32, #tpu.memory_space<vmem>>, vector<1x32x32xf32>
    %158 = vector.shape_cast %157 : vector<1x32x32xf32> to vector<32x32xf32>
    %cst_73 = arith.constant dense<0.000000e+00> : vector<2x32xf32>
    %159 = tpu.matmul %145, %158, %cst_73 {dimension_numbers = #tpu.dot_dimension_numbers<[1], [0], [0], [1], [0, 0, 1, 1], [], []>} : vector<2x32xf32>, vector<32x32xf32>, vector<2x32xf32> -> vector<2x32xf32>
    %c5_74 = arith.constant 5 : index
    %c0_75 = arith.constant 0 : index
    %160 = vector.load %arg6[%c5_74, %c0_75] : memref<9x32xf32, #tpu.memory_space<vmem>>, vector<1x32xf32>
    %161 = vector.shape_cast %160 : vector<1x32xf32> to vector<32xf32>
    %162 = vector.shape_cast %161 : vector<32xf32> to vector<1x32xf32>
    %163 = vector.broadcast %162 : vector<1x32xf32> to vector<2x32xf32>
    %164 = arith.addf %159, %163 : vector<2x32xf32>
    %cst_76 = arith.constant 0.000000e+00 : f32
    %165 = vector.broadcast %cst_76 : f32 to vector<2x32xf32>
    %166 = arith.maximumf %164, %165 : vector<2x32xf32>
    %167 = vector.broadcast %146 : f32 to vector<2x32xf32>
    %168 = arith.mulf %167, %145 : vector<2x32xf32>
    %169 = vector.broadcast %147 : f32 to vector<2x32xf32>
    %170 = arith.mulf %169, %156 : vector<2x32xf32>
    %171 = arith.addf %168, %170 : vector<2x32xf32>
    %172 = vector.broadcast %148 : f32 to vector<2x32xf32>
    %173 = arith.mulf %172, %166 : vector<2x32xf32>
    %174 = arith.addf %171, %173 : vector<2x32xf32>
    %c24 = arith.constant 24 : index
    %175 = memref.load %arg1[%c24] : memref<36xf32, #tpu.memory_space<smem>>
    %c26 = arith.constant 26 : index
    %176 = memref.load %arg1[%c26] : memref<36xf32, #tpu.memory_space<smem>>
    %c27 = arith.constant 27 : index
    %177 = memref.load %arg1[%c27] : memref<36xf32, #tpu.memory_space<smem>>
    %c6_77 = arith.constant 6 : index
    %c0_78 = arith.constant 0 : index
    %c0_79 = arith.constant 0 : index
    %178 = vector.load %arg3[%c6_77, %c0_78, %c0_79] : memref<9x32x32xf32, #tpu.memory_space<vmem>>, vector<1x32x32xf32>
    %179 = vector.shape_cast %178 : vector<1x32x32xf32> to vector<32x32xf32>
    %cst_80 = arith.constant dense<0.000000e+00> : vector<2x32xf32>
    %180 = tpu.matmul %174, %179, %cst_80 {dimension_numbers = #tpu.dot_dimension_numbers<[1], [0], [0], [1], [0, 0, 1, 1], [], []>} : vector<2x32xf32>, vector<32x32xf32>, vector<2x32xf32> -> vector<2x32xf32>
    %c6_81 = arith.constant 6 : index
    %c0_82 = arith.constant 0 : index
    %181 = vector.load %arg4[%c6_81, %c0_82] : memref<9x32xf32, #tpu.memory_space<vmem>>, vector<1x32xf32>
    %182 = vector.shape_cast %181 : vector<1x32xf32> to vector<32xf32>
    %183 = vector.shape_cast %182 : vector<32xf32> to vector<1x32xf32>
    %184 = vector.broadcast %183 : vector<1x32xf32> to vector<2x32xf32>
    %185 = arith.addf %180, %184 : vector<2x32xf32>
    %c6_83 = arith.constant 6 : index
    %c0_84 = arith.constant 0 : index
    %c0_85 = arith.constant 0 : index
    %186 = vector.load %arg5[%c6_83, %c0_84, %c0_85] : memref<9x32x32xf32, #tpu.memory_space<vmem>>, vector<1x32x32xf32>
    %187 = vector.shape_cast %186 : vector<1x32x32xf32> to vector<32x32xf32>
    %cst_86 = arith.constant dense<0.000000e+00> : vector<2x32xf32>
    %188 = tpu.matmul %174, %187, %cst_86 {dimension_numbers = #tpu.dot_dimension_numbers<[1], [0], [0], [1], [0, 0, 1, 1], [], []>} : vector<2x32xf32>, vector<32x32xf32>, vector<2x32xf32> -> vector<2x32xf32>
    %c6_87 = arith.constant 6 : index
    %c0_88 = arith.constant 0 : index
    %189 = vector.load %arg6[%c6_87, %c0_88] : memref<9x32xf32, #tpu.memory_space<vmem>>, vector<1x32xf32>
    %190 = vector.shape_cast %189 : vector<1x32xf32> to vector<32xf32>
    %191 = vector.shape_cast %190 : vector<32xf32> to vector<1x32xf32>
    %192 = vector.broadcast %191 : vector<1x32xf32> to vector<2x32xf32>
    %193 = arith.addf %188, %192 : vector<2x32xf32>
    %cst_89 = arith.constant 0.000000e+00 : f32
    %194 = vector.broadcast %cst_89 : f32 to vector<2x32xf32>
    %195 = arith.maximumf %193, %194 : vector<2x32xf32>
    %196 = vector.broadcast %175 : f32 to vector<2x32xf32>
    %197 = arith.mulf %196, %174 : vector<2x32xf32>
    %198 = vector.broadcast %176 : f32 to vector<2x32xf32>
    %199 = arith.mulf %198, %185 : vector<2x32xf32>
    %200 = arith.addf %197, %199 : vector<2x32xf32>
    %201 = vector.broadcast %177 : f32 to vector<2x32xf32>
    %202 = arith.mulf %201, %195 : vector<2x32xf32>
    %203 = arith.addf %200, %202 : vector<2x32xf32>
    %c28 = arith.constant 28 : index
    %204 = memref.load %arg1[%c28] : memref<36xf32, #tpu.memory_space<smem>>
    %c30 = arith.constant 30 : index
    %205 = memref.load %arg1[%c30] : memref<36xf32, #tpu.memory_space<smem>>
    %c31 = arith.constant 31 : index
    %206 = memref.load %arg1[%c31] : memref<36xf32, #tpu.memory_space<smem>>
    %c7_90 = arith.constant 7 : index
    %c0_91 = arith.constant 0 : index
    %c0_92 = arith.constant 0 : index
    %207 = vector.load %arg3[%c7_90, %c0_91, %c0_92] : memref<9x32x32xf32, #tpu.memory_space<vmem>>, vector<1x32x32xf32>
    %208 = vector.shape_cast %207 : vector<1x32x32xf32> to vector<32x32xf32>
    %cst_93 = arith.constant dense<0.000000e+00> : vector<2x32xf32>
    %209 = tpu.matmul %203, %208, %cst_93 {dimension_numbers = #tpu.dot_dimension_numbers<[1], [0], [0], [1], [0, 0, 1, 1], [], []>} : vector<2x32xf32>, vector<32x32xf32>, vector<2x32xf32> -> vector<2x32xf32>
    %c7_94 = arith.constant 7 : index
    %c0_95 = arith.constant 0 : index
    %210 = vector.load %arg4[%c7_94, %c0_95] : memref<9x32xf32, #tpu.memory_space<vmem>>, vector<1x32xf32>
    %211 = vector.shape_cast %210 : vector<1x32xf32> to vector<32xf32>
    %212 = vector.shape_cast %211 : vector<32xf32> to vector<1x32xf32>
    %213 = vector.broadcast %212 : vector<1x32xf32> to vector<2x32xf32>
    %214 = arith.addf %209, %213 : vector<2x32xf32>
    %c7_96 = arith.constant 7 : index
    %c0_97 = arith.constant 0 : index
    %c0_98 = arith.constant 0 : index
    %215 = vector.load %arg5[%c7_96, %c0_97, %c0_98] : memref<9x32x32xf32, #tpu.memory_space<vmem>>, vector<1x32x32xf32>
    %216 = vector.shape_cast %215 : vector<1x32x32xf32> to vector<32x32xf32>
    %cst_99 = arith.constant dense<0.000000e+00> : vector<2x32xf32>
    %217 = tpu.matmul %203, %216, %cst_99 {dimension_numbers = #tpu.dot_dimension_numbers<[1], [0], [0], [1], [0, 0, 1, 1], [], []>} : vector<2x32xf32>, vector<32x32xf32>, vector<2x32xf32> -> vector<2x32xf32>
    %c7_100 = arith.constant 7 : index
    %c0_101 = arith.constant 0 : index
    %218 = vector.load %arg6[%c7_100, %c0_101] : memref<9x32xf32, #tpu.memory_space<vmem>>, vector<1x32xf32>
    %219 = vector.shape_cast %218 : vector<1x32xf32> to vector<32xf32>
    %220 = vector.shape_cast %219 : vector<32xf32> to vector<1x32xf32>
    %221 = vector.broadcast %220 : vector<1x32xf32> to vector<2x32xf32>
    %222 = arith.addf %217, %221 : vector<2x32xf32>
    %cst_102 = arith.constant 0.000000e+00 : f32
    %223 = vector.broadcast %cst_102 : f32 to vector<2x32xf32>
    %224 = arith.maximumf %222, %223 : vector<2x32xf32>
    %225 = vector.broadcast %204 : f32 to vector<2x32xf32>
    %226 = arith.mulf %225, %203 : vector<2x32xf32>
    %227 = vector.broadcast %205 : f32 to vector<2x32xf32>
    %228 = arith.mulf %227, %214 : vector<2x32xf32>
    %229 = arith.addf %226, %228 : vector<2x32xf32>
    %230 = vector.broadcast %206 : f32 to vector<2x32xf32>
    %231 = arith.mulf %230, %224 : vector<2x32xf32>
    %232 = arith.addf %229, %231 : vector<2x32xf32>
    %c32 = arith.constant 32 : index
    %233 = memref.load %arg1[%c32] : memref<36xf32, #tpu.memory_space<smem>>
    %c34 = arith.constant 34 : index
    %234 = memref.load %arg1[%c34] : memref<36xf32, #tpu.memory_space<smem>>
    %c35 = arith.constant 35 : index
    %235 = memref.load %arg1[%c35] : memref<36xf32, #tpu.memory_space<smem>>
    %c8_103 = arith.constant 8 : index
    %c0_104 = arith.constant 0 : index
    %c0_105 = arith.constant 0 : index
    %236 = vector.load %arg3[%c8_103, %c0_104, %c0_105] : memref<9x32x32xf32, #tpu.memory_space<vmem>>, vector<1x32x32xf32>
    %237 = vector.shape_cast %236 : vector<1x32x32xf32> to vector<32x32xf32>
    %cst_106 = arith.constant dense<0.000000e+00> : vector<2x32xf32>
    %238 = tpu.matmul %232, %237, %cst_106 {dimension_numbers = #tpu.dot_dimension_numbers<[1], [0], [0], [1], [0, 0, 1, 1], [], []>} : vector<2x32xf32>, vector<32x32xf32>, vector<2x32xf32> -> vector<2x32xf32>
    %c8_107 = arith.constant 8 : index
    %c0_108 = arith.constant 0 : index
    %239 = vector.load %arg4[%c8_107, %c0_108] : memref<9x32xf32, #tpu.memory_space<vmem>>, vector<1x32xf32>
    %240 = vector.shape_cast %239 : vector<1x32xf32> to vector<32xf32>
    %241 = vector.shape_cast %240 : vector<32xf32> to vector<1x32xf32>
    %242 = vector.broadcast %241 : vector<1x32xf32> to vector<2x32xf32>
    %243 = arith.addf %238, %242 : vector<2x32xf32>
    %c8_109 = arith.constant 8 : index
    %c0_110 = arith.constant 0 : index
    %c0_111 = arith.constant 0 : index
    %244 = vector.load %arg5[%c8_109, %c0_110, %c0_111] : memref<9x32x32xf32, #tpu.memory_space<vmem>>, vector<1x32x32xf32>
    %245 = vector.shape_cast %244 : vector<1x32x32xf32> to vector<32x32xf32>
    %cst_112 = arith.constant dense<0.000000e+00> : vector<2x32xf32>
    %246 = tpu.matmul %232, %245, %cst_112 {dimension_numbers = #tpu.dot_dimension_numbers<[1], [0], [0], [1], [0, 0, 1, 1], [], []>} : vector<2x32xf32>, vector<32x32xf32>, vector<2x32xf32> -> vector<2x32xf32>
    %c8_113 = arith.constant 8 : index
    %c0_114 = arith.constant 0 : index
    %247 = vector.load %arg6[%c8_113, %c0_114] : memref<9x32xf32, #tpu.memory_space<vmem>>, vector<1x32xf32>
    %248 = vector.shape_cast %247 : vector<1x32xf32> to vector<32xf32>
    %249 = vector.shape_cast %248 : vector<32xf32> to vector<1x32xf32>
    %250 = vector.broadcast %249 : vector<1x32xf32> to vector<2x32xf32>
    %251 = arith.addf %246, %250 : vector<2x32xf32>
    %cst_115 = arith.constant 0.000000e+00 : f32
    %252 = vector.broadcast %cst_115 : f32 to vector<2x32xf32>
    %253 = arith.maximumf %251, %252 : vector<2x32xf32>
    %254 = vector.broadcast %233 : f32 to vector<2x32xf32>
    %255 = arith.mulf %254, %232 : vector<2x32xf32>
    %256 = vector.broadcast %234 : f32 to vector<2x32xf32>
    %257 = arith.mulf %256, %243 : vector<2x32xf32>
    %258 = arith.addf %255, %257 : vector<2x32xf32>
    %259 = vector.broadcast %235 : f32 to vector<2x32xf32>
    %260 = arith.mulf %259, %253 : vector<2x32xf32>
    %261 = arith.addf %258, %260 : vector<2x32xf32>
    %c0_116 = arith.constant 0 : index
    %c0_117 = arith.constant 0 : index
    %262 = vector.load %arg7[%c0_116, %c0_117] : memref<2x32xf32, #tpu.memory_space<vmem>>, vector<2x32xf32>
    tpu.vector_store %arg7[%c0_116, %c0_117], %261 {strides = array<i32>} : memref<2x32xf32, #tpu.memory_space<vmem>>, vector<2x32xf32>,
    return
  }
  func.func @transform_0(%arg0: i32) -> i32 {
    %c0_i32 = arith.constant 0 : i32
    %c0_i32_0 = arith.constant 0 : i32
    return %c0_i32 : i32
  }
  func.func @transform_1(%arg0: i32) -> (i32, i32) {
    %c0_i32 = arith.constant 0 : i32
    %c0_i32_0 = arith.constant 0 : i32
    return %arg0, %c0_i32 : i32, i32
  }
  func.func @transform_2(%arg0: i32) -> (i32, i32, i32) {
    %c0_i32 = arith.constant 0 : i32
    %c0_i32_0 = arith.constant 0 : i32
    %c0_i32_1 = arith.constant 0 : i32
    %c0_i32_2 = arith.constant 0 : i32
    return %c0_i32, %c0_i32_0, %c0_i32_1 : i32, i32, i32
  }
  func.func @transform_3(%arg0: i32) -> (i32, i32) {
    %c0_i32 = arith.constant 0 : i32
    %c0_i32_0 = arith.constant 0 : i32
    %c0_i32_1 = arith.constant 0 : i32
    return %c0_i32, %c0_i32_0 : i32, i32
  }
  func.func @transform_4(%arg0: i32) -> (i32, i32, i32) {
    %c0_i32 = arith.constant 0 : i32
    %c0_i32_0 = arith.constant 0 : i32
    %c0_i32_1 = arith.constant 0 : i32
    %c0_i32_2 = arith.constant 0 : i32
    return %c0_i32, %c0_i32_0, %c0_i32_1 : i32, i32, i32
  }
  func.func @transform_5(%arg0: i32) -> (i32, i32) {
    %c0_i32 = arith.constant 0 : i32
    %c0_i32_0 = arith.constant 0 : i32
    %c0_i32_1 = arith.constant 0 : i32
    return %c0_i32, %c0_i32_0 : i32, i32
  }
  func.func @transform_6(%arg0: i32) -> (i32, i32) {
    %c0_i32 = arith.constant 0 : i32
    %c0_i32_0 = arith.constant 0 : i32
    return %arg0, %c0_i32 : i32, i32
  }
}

</mosaic_0001>

<bundles_post_ra>
// kernel: tpu_custom_call.1
= control target key start
LH: loop header
LB: loop body
LE: loop exit
PB: predicated region body
PF: predicated region fallthrough
CT: control target
= control target key end

     0   :  { %11 = vsyncpa [#allocation5], 0  ;;  %s1088_s0 = inlined_call_operand.hbm [shape: f32[36], index: 0, kind: input, shape index: {}]   ;;  %s1089_s1 = inlined_call_operand.hbm [shape: f32[2,32], index: 1, kind: input, shape index: {}]   ;;  %s1090_s2 = inlined_call_operand.hbm [shape: f32[9,32,32], index: 2, kind: input, shape index: {}]   ;;  %s1091_s3 = inlined_call_operand.hbm [shape: f32[9,32], index: 3, kind: input, shape index: {}]   ;;  %s1092_s4 = inlined_call_operand.hbm [shape: f32[9,32,32], index: 4, kind: input, shape index: {}]   ;;  %s1093_s5 = inlined_call_operand.hbm [shape: f32[9,32], index: 5, kind: input, shape index: {}]   ;;  %s1094_s6 = inlined_call_operand.hbm [shape: f32[2,32], index: 6, kind: output, shape index: {}]  }
   0x1   :  { %12 = vsyncpa [#allocation3], 0 }
   0x2   :  { %13 = vsyncpa [#allocation8], 0 }
   0x3   :  { %14 = vsyncpa [#allocation11], 0  ;;  %s40_s23 = sshll.u32 %s1090_s2, 4  ;;  %s41_s23 = int_to_ptr.hbm [resolvable:$true] %s40_s23 }
   0x4   :  { %15 = vsyncpa [#allocation4], 0  ;;  %s993_s24 = smov [#allocation7]   ;;  %s66_s28 = sshll.u32 %s1092_s4, 4  ;;  %s67_s28 = int_to_ptr.hbm [resolvable:$true] %s66_s28 }
   0x5   :  { %s42_s25 = sshll.u32 %s993_s24, 4  ;;  %s994_s29 = smov 128   ;;  %s43_s25 = int_to_ptr.vmem [resolvable:$true] %s42_s25 }
   0x6   :  { %s995_s30 = smov 8   ;;  %s996_s7 = smov [#allocation10]  }
   0x7   :  { %48 = dma.hbm_to_vmem [thread:$0]  %s41_s23, 4608, %s43_s25, [#allocation8], %s994_s29, %s994_s29, %s995_s30  }
   0x8   :  { %s68_s8 = sshll.u32 %s996_s7, 4  ;;  %s21_s10 = sshll.u32 %s1088_s0, 4  ;;  %s69_s8 = int_to_ptr.vmem [resolvable:$true] %s68_s8  ;;  %s22_s10 = int_to_ptr.hbm [resolvable:$true] %s21_s10 }
   0x9   :  { %74 = dma.hbm_to_vmem [thread:$0]  %s67_s28, 4608, %s69_s8, [#allocation11], %s994_s29, %s994_s29, %s995_s30  }
   0xa   :  { %s30_s12 = sshll.u32 %s1089_s1, 4  ;;  %s997_s13 = smov [#allocation2]   ;;  %s31_s12 = int_to_ptr.hbm [resolvable:$true] %s30_s12 }
   0xb   :  { %24 = dma.hbm_to_smem %s22_s10, 16, %s997_s13, [#allocation5]  }
   0xc   :  { %s998_s14 = smov [#allocation6]   ;;  %s53_s18 = sshll.u32 %s1091_s3, 4  ;;  %s54_s18 = int_to_ptr.hbm [resolvable:$true] %s53_s18 }
   0xd   :  { %s32_s15 = sshll.u32 %s998_s14, 4  ;;  %s79_s20 = sshll.u32 %s1093_s5, 4  ;;  %s33_s15 = int_to_ptr.vmem [resolvable:$true] %s32_s15  ;;  %s80_s20 = int_to_ptr.hbm [resolvable:$true] %s79_s20 }
   0xe   :  { %35 = dma.hbm_to_vmem [thread:$0]  %s31_s12, 32, %s33_s15, [#allocation3]  }
   0xf   :  { %s999_s21 = smov [#allocation9]   ;;  %s1000_s1 = smov [#allocation12]  }
  0x10   :  { %s55_s22 = sshll.u32 %s999_s21, 4  ;;  %s81_s23 = sshll.u32 %s1000_s1, 4  ;;  %s56_s22 = int_to_ptr.vmem [resolvable:$true] %s55_s22  ;;  %s82_s23 = int_to_ptr.vmem [resolvable:$true] %s81_s23 }
  0x11   :  { %61 = dma.hbm_to_vmem [thread:$0]  %s54_s18, 256, %s56_s22, [#allocation8], %s994_s29, %s994_s29, %s995_s30  }
  0x12   :  { %87 = dma.hbm_to_vmem [thread:$0]  %s80_s20, 256, %s82_s23, [#allocation11], %s994_s29, %s994_s29, %s995_s30  }
  0x13   :  { %983 = dma.done.wait [#allocation5], 16  }
  0x14   :  { %984 = vsyncadd [#allocation5], 4294967280 }
  0x15   :  { %985 = dma.done.wait [#allocation3], 32  }
  0x16   :  { %986 = vsyncadd [#allocation3], 4294967264 }
  0x17   :  { %987 = dma.done.wait [#allocation8], 4864  }
  0x18   :  { %988 = vsyncadd [#allocation8], 4294962432 }
  0x19   :  { %989 = dma.done.wait [#allocation11], 4864  }
  0x1a   :  { %990 = vsyncadd [#allocation11], 4294962432 }
  0x1b   :  { %112 = sfence }
  0x1c   :  { %v120_v0 = vld [vmem:[#allocation7 + $0x18] sm:$0xff]  ;;  %v150_v1 = vld [vmem:[#allocation10 + $0x18] sm:$0xff]  ;;  %v119_v2 = vld [vmem:[#allocation7 + $0x10] sm:$0xff]  ;;  %vm123_vm0 = vcmask 261120   ;;  %s114_s3 = sld [smem:[#allocation2]]  ;;  %s1001_s22 = smov [#allocation13]  }
  0x1d   :  { %139 = vmatpush.msra.mxu0 %v120_v0  ;;  %165 = vmatpush.msra.mxu1 %v150_v1  ;;  %v149_v3 = vld [vmem:[#allocation10 + $0x10] sm:$0xff]  ;;  %v118_v4 = vld [vmem:[#allocation7 + $0x8] sm:$0xff]  ;;  %v148_v5 = vld [vmem:[#allocation10 + $0x8] sm:$0xff]  ;;  %s756_s5 = sld [smem:[#allocation2 + $0x2]]  ;;  %s741_s1 = sshll.u32 %s1001_s22, 4  ;;  %vm734_vm1 = vcmask 254976   ;;  %s742_s1 = int_to_ptr.vmem [resolvable:$true] %s741_s1 }
  0x1e   :  { %v117_v6 = vld [vmem:[#allocation7] sm:$0xff]  ;;  %v147_v7 = vld [vmem:[#allocation10] sm:$0xff]  ;;  %v113_v8 = vld [vmem:[#allocation6] sm:$0x3]  ;;  %s757_s24 = sld [smem:[#allocation2 + $0x3]] }
  0x1f   :  { %140 = vmatpush.msra.mxu0 %v119_v2  ;;  %166 = vmatpush.msra.mxu1 %v149_v3  ;;  %v189_v9 = vld [vmem:[#allocation7 + $0x38] sm:$0xff]  ;;  %v219_v10 = vld [vmem:[#allocation10 + $0x38] sm:$0xff]  ;;  %v188_v11 = vld [vmem:[#allocation7 + $0x30] sm:$0xff]  ;;  %s760_s25 = sld [smem:[#allocation2 + $0x4]] }
  0x20   :  { %207 = vmatpush.msra.mxu2 %v189_v9  ;;  %234 = vmatpush.msra.mxu3 %v219_v10  ;;  %v218_v12 = vld [vmem:[#allocation10 + $0x30] sm:$0xff]  ;;  %v187_v13 = vld [vmem:[#allocation7 + $0x28] sm:$0xff]  ;;  %v217_v14 = vld [vmem:[#allocation10 + $0x28] sm:$0xff]  ;;  %s761_s26 = sld [smem:[#allocation2 + $0x6]] }
  0x21   :  { %141 = vmatpush.msra.mxu0 %v118_v4  ;;  %167 = vmatpush.msra.mxu1 %v148_v5  ;;  %v186_v15 = vld [vmem:[#allocation7 + $0x20] sm:$0xff]  ;;  %v216_v16 = vld [vmem:[#allocation10 + $0x20] sm:$0xff]  ;;  %v258_v32 = vld [vmem:[#allocation7 + $0x58] sm:$0xff]  ;;  %s762_s27 = sld [smem:[#allocation2 + $0x7]] }
  0x22   :  { %208 = vmatpush.msra.mxu2 %v188_v11  ;;  %235 = vmatpush.msra.mxu3 %v218_v12  ;;  %v809_v17 = vld [vmem:[#allocation9] ss:$0 sm:$0xff]  ;;  %v810_v18 = vld [vmem:[#allocation12] ss:$0 sm:$0xff]  ;;  %v174_v19 = vstv %s114_s3  ;;  %v288_v33 = vld [vmem:[#allocation10 + $0x58] sm:$0xff]  ;;  %s765_s28 = sld [smem:[#allocation2 + $0x8]] }
  0x23   :  { %142 = vmatpush.msra.mxu0 %v117_v6  ;;  %168 = vmatpush.msra.mxu1 %v147_v7  ;;  %v176_v21 = vstv %s756_s5  ;;  %v175_v23 = vmul.f32 %v174_v19, %v113_v8  ;;  %v257_v34 = vld [vmem:[#allocation7 + $0x50] sm:$0xff]  ;;  %v287_v35 = vld [vmem:[#allocation10 + $0x50] sm:$0xff]  ;;  %v256_v36 = vld [vmem:[#allocation7 + $0x48] sm:$0xff]  ;;  %s766_s29 = sld [smem:[#allocation2 + $0xa]]  ;;  %s743_s5 = sshll.u32 %s1094_s6, 4  ;;  %s744_s5 = int_to_ptr.hbm [resolvable:$true] %s743_s5 }
  0x24   :  { %758 = vmatmul.msk.f32.vlgmr.msra.gmra.mxu0 %vm123_vm0, %v113_v8  ;;  %759 = vmatmul.msk.f32.vlgmr.msra.gmra.mxu1 %vm123_vm0, %v113_v8  ;;  %v179_v26 = vstv %s757_s24  ;;  %v286_v37 = vld [vmem:[#allocation10 + $0x48] sm:$0xff]  ;;  %v255_v38 = vld [vmem:[#allocation7 + $0x40] sm:$0xff]  ;;  %v285_v39 = vld [vmem:[#allocation10 + $0x40] sm:$0xff]  ;;  %s767_s30 = sld [smem:[#allocation2 + $0xb]] }
  0x25   :  { %209 = vmatpush.msra.mxu2 %v187_v13  ;;  %236 = vmatpush.msra.mxu3 %v217_v14  ;;  %v811_v40 = vld [vmem:[#allocation9 + $0x1] ss:$0 sm:$0xff]  ;;  %v812_v41 = vld [vmem:[#allocation12 + $0x1] ss:$0 sm:$0xff]  ;;  %v243_v43 = vstv %s760_s25  ;;  %v327_v55 = vld [vmem:[#allocation7 + $0x78] sm:$0xff]  ;;  %s770_s7 = sld [smem:[#allocation2 + $0xc]] }
  0x26   :  { %276 = vmatpush.msrb.mxu0 %v258_v32  ;;  %303 = vmatpush.msrb.mxu1 %v288_v33  ;;  %v245_v44 = vstv %s761_s26  ;;  %v357_v56 = vld [vmem:[#allocation10 + $0x78] sm:$0xff]  ;;  %v326_v57 = vld [vmem:[#allocation7 + $0x70] sm:$0xff]  ;;  %v356_v58 = vld [vmem:[#allocation10 + $0x70] sm:$0xff]  ;;  %s771_s8 = sld [smem:[#allocation2 + $0xe]] }
  0x27   :  { %210 = vmatpush.msra.mxu2 %v186_v15  ;;  %237 = vmatpush.msra.mxu3 %v216_v16  ;;  %v248_v48 = vstv %s762_s27  ;;  %v325_v59 = vld [vmem:[#allocation7 + $0x68] sm:$0xff]  ;;  %v355_v60 = vld [vmem:[#allocation10 + $0x68] sm:$0xff]  ;;  %v324_v61 = vld [vmem:[#allocation7 + $0x60] sm:$0xff]  ;;  %s772_s9 = sld [smem:[#allocation2 + $0xf]] }
  0x28   :  { %277 = vmatpush.msrb.mxu0 %v257_v34  ;;  %304 = vmatpush.msrb.mxu1 %v287_v35  ;;  %v354_v62 = vld [vmem:[#allocation10 + $0x60] sm:$0xff]  ;;  %v813_v63 = vld [vmem:[#allocation9 + $0x2] ss:$0 sm:$0xff]  ;;  %v312_v2 = vstv %s765_s28  ;;  %v396_v14 = vld [vmem:[#allocation7 + $0x98] sm:$0xff]  ;;  %s775_s2 = sld [smem:[#allocation2 + $0x10]] }
  0x29   :  { %345 = vmatpush.msrb.mxu2 %v327_v55  ;;  %372 = vmatpush.msrb.mxu3 %v357_v56  ;;  %v814_v0 = vld [vmem:[#allocation12 + $0x2] ss:$0 sm:$0xff]  ;;  %v314_v3 = vstv %s766_s29  ;;  %v426_v15 = vld [vmem:[#allocation10 + $0x98] sm:$0xff]  ;;  %v424_v19 = vld [vmem:[#allocation10 + $0x88] sm:$0xff]  ;;  %s776_s10 = sld [smem:[#allocation2 + $0x12]] }
  0x2a   :  { %278 = vmatpush.msrb.mxu0 %v256_v36  ;;  %305 = vmatpush.msrb.mxu1 %v286_v37  ;;  %v317_v7 = vstv %s767_s30  ;;  %v395_v16 = vld [vmem:[#allocation7 + $0x90] sm:$0xff]  ;;  %v465_v37 = vld [vmem:[#allocation7 + $0xb8] sm:$0xff]  ;;  %s777_s4 = sld [smem:[#allocation2 + $0x13]] }
  0x2b   :  { %346 = vmatpush.msrb.mxu2 %v326_v57  ;;  %373 = vmatpush.msrb.mxu3 %v356_v58  ;;  %s780_s11 = sld [smem:[#allocation2 + $0x14]] }
  0x2c   :  { %279 = vmatpush.msrb.mxu0 %v255_v38  ;;  %306 = vmatpush.msrb.mxu1 %v285_v39  ;;  %v495_v38 = vld [vmem:[#allocation10 + $0xb8] sm:$0xff]  ;;  %v464_v39 = vld [vmem:[#allocation7 + $0xb0] sm:$0xff]  ;;  %s781_s12 = sld [smem:[#allocation2 + $0x16]] }
  0x2d   :  { %347 = vmatpush.msrb.mxu2 %v325_v59  ;;  %374 = vmatpush.msrb.mxu3 %v355_v60  ;;  %v534_v60 = vld [vmem:[#allocation7 + $0xd8] sm:$0xff]  ;;  %s782_s13 = sld [smem:[#allocation2 + $0x17]] }
  0x2e   :  { %414 = vmatpush.msra.mxu0 %v396_v14  ;;  %441 = vmatpush.msra.mxu1 %v426_v15  ;;  %s785_s14 = sld [smem:[#allocation2 + $0x18]] }
  0x2f   :  { %348 = vmatpush.msrb.mxu2 %v324_v61  ;;  %375 = vmatpush.msrb.mxu3 %v354_v62  ;;  %v564_v61 = vld [vmem:[#allocation10 + $0xd8] sm:$0xff]  ;;  %v533_v62 = vld [vmem:[#allocation7 + $0xd0] sm:$0xff]  ;;  %s786_s15 = sld [smem:[#allocation2 + $0x1a]] }
  0x30   :  { %415 = vmatpush.msra.mxu0 %v395_v16  ;;  %s787_s16 = sld [smem:[#allocation2 + $0x1b]] }
  0x31   :  { %s790_s17 = sld [smem:[#allocation2 + $0x1c]] }
  0x32   :  { %s791_s18 = sld [smem:[#allocation2 + $0x1e]] }
  0x33   :  { %s792_s0 = sld [smem:[#allocation2 + $0x1f]] }
  0x34   :  { %s795_s19 = sld [smem:[#allocation2 + $0x20]] }
  0x35   :  { %s796_s20 = sld [smem:[#allocation2 + $0x22]] }
  0x36   :  { %s797_s21 = sld [smem:[#allocation2 + $0x23]] }
  0xa1   :  { %v144_v20 = vpop.f32.mrf.mxu0  ;;  %v170_v22 = vpop.f32.mrf.mxu1 }
  0xa2   :  { %v145_v24 = vadd.f32 %v809_v17, %v144_v20  ;;  %v171_v25 = vadd.f32 %v810_v18, %v170_v22  ;;  %v425_v17 = vld [vmem:[#allocation10 + $0x90] sm:$0xff]  ;;  %v394_v18 = vld [vmem:[#allocation7 + $0x88] sm:$0xff] }
  0xa3   :  { %442 = vmatpush.msra.mxu1 %v425_v17  ;;  %416 = vmatpush.msra.mxu0 %v394_v18  ;;  %v393_v20 = vld [vmem:[#allocation7 + $0x80] sm:$0xff] }
  0xa4   :  { %v177_v27 = vmul.f32 %v176_v21, %v145_v24  ;;  %v173_v28 = vmax.f32 %v171_v25, 0.0  ;;  %v423_v21 = vld [vmem:[#allocation10 + $0x80] sm:$0xff]  ;;  %v815_v22 = vld [vmem:[#allocation9 + $0x3] ss:$0 sm:$0xff]  ;;  %v381_v25 = vstv %s770_s7 }
  0xa5   :  { %443 = vmatpush.msra.mxu1 %v424_v19  ;;  %417 = vmatpush.msra.mxu0 %v393_v20  ;;  %v603_v19 = vld [vmem:[#allocation7 + $0xf8] sm:$0xff]  ;;  %v633_v20 = vld [vmem:[#allocation10 + $0xf8] sm:$0xff] }
  0xa6   :  { %v178_v29 = vadd.f32 %v177_v27, %v175_v23  ;;  %v180_v30 = vmul.f32 %v179_v26, %v173_v28  ;;  %v816_v23 = vld [vmem:[#allocation12 + $0x3] ss:$0 sm:$0xff]  ;;  %v383_v26 = vstv %s771_s8 }
  0xa7   :  { %444 = vmatpush.msra.mxu1 %v423_v21  ;;  %v602_v21 = vld [vmem:[#allocation7 + $0xf0] sm:$0xff] }
  0xa8   :  { %v181_v31 = vadd.f32 %v180_v30, %v178_v29  ;;  %v386_v30 = vstv %s772_s9 }
  0xaa   :  { %763 = vmatmul.msk.f32.vlgmr.msra.gmra.mxu2 %vm123_vm0, %v181_v31  ;;  %764 = vmatmul.msk.f32.vlgmr.msra.gmra.mxu3 %vm123_vm0, %v181_v31  ;;  %v244_v49 = vmul.f32 %v243_v43, %v181_v31  ;;  %v462_v43 = vld [vmem:[#allocation7 + $0xa0] sm:$0xff] }
  0xab   :  { %483 = vmatpush.msra.mxu2 %v465_v37  ;;  %510 = vmatpush.msra.mxu3 %v495_v38 }
  0xad   :  { %484 = vmatpush.msra.mxu2 %v464_v39 }
 0x12d   :  { %v212_v42 = vpop.f32.mrf.mxu2  ;;  %v239_v45 = vpop.f32.mrf.mxu3 }
 0x12e   :  { %v213_v46 = vadd.f32 %v811_v40, %v212_v42  ;;  %v240_v47 = vadd.f32 %v812_v41, %v239_v45  ;;  %v494_v40 = vld [vmem:[#allocation10 + $0xb0] sm:$0xff]  ;;  %v463_v41 = vld [vmem:[#allocation7 + $0xa8] sm:$0xff]  ;;  %v493_v42 = vld [vmem:[#allocation10 + $0xa8] sm:$0xff] }
 0x12f   :  { %511 = vmatpush.msra.mxu3 %v494_v40  ;;  %485 = vmatpush.msra.mxu2 %v463_v41  ;;  %v817_v45 = vld [vmem:[#allocation9 + $0x4] ss:$0 sm:$0xff] }
 0x130   :  { %v246_v50 = vmul.f32 %v245_v44, %v213_v46  ;;  %v242_v51 = vmax.f32 %v240_v47, 0.0  ;;  %v492_v44 = vld [vmem:[#allocation10 + $0xa0] sm:$0xff] }
 0x131   :  { %512 = vmatpush.msra.mxu3 %v493_v42  ;;  %486 = vmatpush.msra.mxu2 %v462_v43  ;;  %v818_v46 = vld [vmem:[#allocation12 + $0x4] ss:$0 sm:$0xff]  ;;  %v672_v42 = vld [vmem:[#allocation7 + $0x118] sm:$0xff]  ;;  %v702_v43 = vld [vmem:[#allocation10 + $0x118] sm:$0xff] }
 0x132   :  { %v247_v52 = vadd.f32 %v246_v50, %v244_v49  ;;  %v249_v53 = vmul.f32 %v248_v48, %v242_v51  ;;  %v450_v48 = vstv %s775_s2  ;;  %v452_v49 = vstv %s776_s10 }
 0x133   :  { %513 = vmatpush.msra.mxu3 %v492_v44  ;;  %v671_v44 = vld [vmem:[#allocation7 + $0x110] sm:$0xff] }
 0x134   :  { %v250_v54 = vadd.f32 %v249_v53, %v247_v52  ;;  %v455_v53 = vstv %s777_s4 }
 0x136   :  { %768 = vmatmul.msk.f32.vlgmr.msrb.gmra.mxu0 %vm123_vm0, %v250_v54  ;;  %769 = vmatmul.msk.f32.vlgmr.msrb.gmra.mxu1 %vm123_vm0, %v250_v54  ;;  %v313_v8 = vmul.f32 %v312_v2, %v250_v54  ;;  %v531_v2 = vld [vmem:[#allocation7 + $0xc0] sm:$0xff] }
 0x137   :  { %552 = vmatpush.msrb.mxu0 %v534_v60  ;;  %579 = vmatpush.msrb.mxu1 %v564_v61 }
 0x139   :  { %553 = vmatpush.msrb.mxu0 %v533_v62 }
 0x1b3   :  { %v281_v1 = vpop.f32.mrf.mxu0  ;;  %v308_v4 = vpop.f32.mrf.mxu1 }
 0x1b4   :  { %v282_v5 = vadd.f32 %v813_v63, %v281_v1  ;;  %v309_v6 = vadd.f32 %v814_v0, %v308_v4  ;;  %v563_v63 = vld [vmem:[#allocation10 + $0xd0] sm:$0xff]  ;;  %v532_v0 = vld [vmem:[#allocation7 + $0xc8] sm:$0xff]  ;;  %v562_v1 = vld [vmem:[#allocation10 + $0xc8] sm:$0xff] }
 0x1b5   :  { %580 = vmatpush.msrb.mxu1 %v563_v63  ;;  %554 = vmatpush.msrb.mxu0 %v532_v0  ;;  %v819_v4 = vld [vmem:[#allocation9 + $0x5] ss:$0 sm:$0xff] }
 0x1b6   :  { %v315_v9 = vmul.f32 %v314_v3, %v282_v5  ;;  %v311_v10 = vmax.f32 %v309_v6, 0.0  ;;  %v561_v3 = vld [vmem:[#allocation10 + $0xc0] sm:$0xff] }
 0x1b7   :  { %581 = vmatpush.msrb.mxu1 %v562_v1  ;;  %555 = vmatpush.msrb.mxu0 %v531_v2  ;;  %v820_v5 = vld [vmem:[#allocation12 + $0x5] ss:$0 sm:$0xff]  ;;  %v825_v1 = vld [vmem:[#allocation9 + $0x8] ss:$0 sm:$0xff]  ;;  %v826_v2 = vld [vmem:[#allocation12 + $0x8] ss:$0 sm:$0xff] }
 0x1b8   :  { %v316_v11 = vadd.f32 %v315_v9, %v313_v8  ;;  %v318_v12 = vmul.f32 %v317_v7, %v311_v10  ;;  %v519_v7 = vstv %s780_s11  ;;  %v521_v8 = vstv %s781_s12 }
 0x1b9   :  { %582 = vmatpush.msrb.mxu1 %v561_v3 }
 0x1ba   :  { %v319_v13 = vadd.f32 %v318_v12, %v316_v11  ;;  %v524_v12 = vstv %s782_s13 }
 0x1bc   :  { %773 = vmatmul.msk.f32.vlgmr.msrb.gmra.mxu2 %vm123_vm0, %v319_v13  ;;  %774 = vmatmul.msk.f32.vlgmr.msrb.gmra.mxu3 %vm123_vm0, %v319_v13  ;;  %v382_v31 = vmul.f32 %v381_v25, %v319_v13  ;;  %v600_v25 = vld [vmem:[#allocation7 + $0xe0] sm:$0xff] }
 0x1bd   :  { %621 = vmatpush.msrb.mxu2 %v603_v19  ;;  %648 = vmatpush.msrb.mxu3 %v633_v20 }
 0x1bf   :  { %622 = vmatpush.msrb.mxu2 %v602_v21 }
 0x23f   :  { %v350_v24 = vpop.f32.mrf.mxu2  ;;  %v377_v27 = vpop.f32.mrf.mxu3 }
 0x240   :  { %v351_v28 = vadd.f32 %v815_v22, %v350_v24  ;;  %v378_v29 = vadd.f32 %v816_v23, %v377_v27  ;;  %v632_v22 = vld [vmem:[#allocation10 + $0xf0] sm:$0xff]  ;;  %v601_v23 = vld [vmem:[#allocation7 + $0xe8] sm:$0xff]  ;;  %v631_v24 = vld [vmem:[#allocation10 + $0xe8] sm:$0xff] }
 0x241   :  { %649 = vmatpush.msrb.mxu3 %v632_v22  ;;  %623 = vmatpush.msrb.mxu2 %v601_v23  ;;  %v821_v27 = vld [vmem:[#allocation9 + $0x6] ss:$0 sm:$0xff] }
 0x242   :  { %v384_v32 = vmul.f32 %v383_v26, %v351_v28  ;;  %v380_v33 = vmax.f32 %v378_v29, 0.0  ;;  %v630_v26 = vld [vmem:[#allocation10 + $0xe0] sm:$0xff] }
 0x243   :  { %650 = vmatpush.msrb.mxu3 %v631_v24  ;;  %624 = vmatpush.msrb.mxu2 %v600_v25  ;;  %v822_v28 = vld [vmem:[#allocation12 + $0x6] ss:$0 sm:$0xff] }
 0x244   :  { %v385_v34 = vadd.f32 %v384_v32, %v382_v31  ;;  %v387_v35 = vmul.f32 %v386_v30, %v380_v33  ;;  %v588_v30 = vstv %s785_s14  ;;  %v590_v31 = vstv %s786_s15 }
 0x245   :  { %651 = vmatpush.msrb.mxu3 %v630_v26 }
 0x246   :  { %v388_v36 = vadd.f32 %v387_v35, %v385_v34  ;;  %v593_v35 = vstv %s787_s16 }
 0x248   :  { %778 = vmatmul.msk.f32.vlgmr.msra.gmra.mxu0 %vm123_vm0, %v388_v36  ;;  %779 = vmatmul.msk.f32.vlgmr.msra.gmra.mxu1 %vm123_vm0, %v388_v36  ;;  %v451_v54 = vmul.f32 %v450_v48, %v388_v36  ;;  %v669_v48 = vld [vmem:[#allocation7 + $0x100] sm:$0xff] }
 0x249   :  { %690 = vmatpush.msra.mxu0 %v672_v42  ;;  %717 = vmatpush.msra.mxu1 %v702_v43 }
 0x24b   :  { %691 = vmatpush.msra.mxu0 %v671_v44 }
 0x2c5   :  { %v419_v47 = vpop.f32.mrf.mxu0  ;;  %v446_v50 = vpop.f32.mrf.mxu1 }
 0x2c6   :  { %v420_v51 = vadd.f32 %v817_v45, %v419_v47  ;;  %v447_v52 = vadd.f32 %v818_v46, %v446_v50  ;;  %v701_v45 = vld [vmem:[#allocation10 + $0x110] sm:$0xff]  ;;  %v670_v46 = vld [vmem:[#allocation7 + $0x108] sm:$0xff]  ;;  %v700_v47 = vld [vmem:[#allocation10 + $0x108] sm:$0xff] }
 0x2c7   :  { %718 = vmatpush.msra.mxu1 %v701_v45  ;;  %692 = vmatpush.msra.mxu0 %v670_v46  ;;  %v823_v50 = vld [vmem:[#allocation9 + $0x7] ss:$0 sm:$0xff] }
 0x2c8   :  { %v453_v55 = vmul.f32 %v452_v49, %v420_v51  ;;  %v449_v56 = vmax.f32 %v447_v52, 0.0  ;;  %v699_v49 = vld [vmem:[#allocation10 + $0x100] sm:$0xff] }
 0x2c9   :  { %719 = vmatpush.msra.mxu1 %v700_v47  ;;  %693 = vmatpush.msra.mxu0 %v669_v48  ;;  %v824_v51 = vld [vmem:[#allocation12 + $0x7] ss:$0 sm:$0xff] }
 0x2ca   :  { %v454_v57 = vadd.f32 %v453_v55, %v451_v54  ;;  %v456_v58 = vmul.f32 %v455_v53, %v449_v56  ;;  %v657_v53 = vstv %s790_s17  ;;  %v659_v54 = vstv %s791_s18 }
 0x2cb   :  { %720 = vmatpush.msra.mxu1 %v699_v49 }
 0x2cc   :  { %v457_v59 = vadd.f32 %v456_v58, %v454_v57  ;;  %v662_v58 = vstv %s792_s0 }
 0x2ce   :  { %783 = vmatmul.msk.f32.vlgmr.msra.gmra.mxu2 %vm123_vm0, %v457_v59  ;;  %784 = vmatmul.msk.f32.vlgmr.msra.gmra.mxu3 %vm123_vm0, %v457_v59  ;;  %v520_v13 = vmul.f32 %v519_v7, %v457_v59 }
 0x351   :  { %v488_v6 = vpop.f32.mrf.mxu2  ;;  %v515_v9 = vpop.f32.mrf.mxu3 }
 0x352   :  { %v489_v10 = vadd.f32 %v819_v4, %v488_v6  ;;  %v516_v11 = vadd.f32 %v820_v5, %v515_v9  ;;  %v726_v4 = vstv %s795_s19  ;;  %v728_v5 = vstv %s796_s20 }
 0x353   :  { %v731_v9 = vstv %s797_s21 }
 0x354   :  { %v522_v14 = vmul.f32 %v521_v8, %v489_v10  ;;  %v518_v15 = vmax.f32 %v516_v11, 0.0 }
 0x356   :  { %v523_v16 = vadd.f32 %v522_v14, %v520_v13  ;;  %v525_v17 = vmul.f32 %v524_v12, %v518_v15 }
 0x358   :  { %v526_v18 = vadd.f32 %v525_v17, %v523_v16 }
 0x35a   :  { %788 = vmatmul.msk.f32.vlgmr.msrb.gmra.mxu0 %vm123_vm0, %v526_v18  ;;  %789 = vmatmul.msk.f32.vlgmr.msrb.gmra.mxu1 %vm123_vm0, %v526_v18  ;;  %v589_v36 = vmul.f32 %v588_v30, %v526_v18 }
 0x3d7   :  { %v557_v29 = vpop.f32.mrf.mxu0  ;;  %v584_v32 = vpop.f32.mrf.mxu1 }
 0x3d8   :  { %v558_v33 = vadd.f32 %v821_v27, %v557_v29  ;;  %v585_v34 = vadd.f32 %v822_v28, %v584_v32 }
 0x3da   :  { %v591_v37 = vmul.f32 %v590_v31, %v558_v33  ;;  %v587_v38 = vmax.f32 %v585_v34, 0.0 }
 0x3dc   :  { %v592_v39 = vadd.f32 %v591_v37, %v589_v36  ;;  %v594_v40 = vmul.f32 %v593_v35, %v587_v38 }
 0x3de   :  { %v595_v41 = vadd.f32 %v594_v40, %v592_v39 }
 0x3e0   :  { %793 = vmatmul.msk.f32.vlgmr.msrb.gmra.mxu2 %vm123_vm0, %v595_v41  ;;  %794 = vmatmul.msk.f32.vlgmr.msrb.gmra.mxu3 %vm123_vm0, %v595_v41  ;;  %v658_v59 = vmul.f32 %v657_v53, %v595_v41 }
 0x463   :  { %v626_v52 = vpop.f32.mrf.mxu2  ;;  %v653_v55 = vpop.f32.mrf.mxu3 }
 0x464   :  { %v627_v56 = vadd.f32 %v823_v50, %v626_v52  ;;  %v654_v57 = vadd.f32 %v824_v51, %v653_v55 }
 0x466   :  { %v660_v60 = vmul.f32 %v659_v54, %v627_v56  ;;  %v656_v61 = vmax.f32 %v654_v57, 0.0 }
 0x468   :  { %v661_v62 = vadd.f32 %v660_v60, %v658_v59  ;;  %v663_v63 = vmul.f32 %v662_v58, %v656_v61 }
 0x46a   :  { %v664_v0 = vadd.f32 %v663_v63, %v661_v62 }
 0x46c   :  { %798 = vmatmul.msk.f32.vlgmr.msra.gmra.mxu0 %vm123_vm0, %v664_v0  ;;  %799 = vmatmul.msk.f32.vlgmr.msra.gmra.mxu1 %vm123_vm0, %v664_v0  ;;  %v727_v10 = vmul.f32 %v726_v4, %v664_v0 }
 0x4e9   :  { %v695_v3 = vpop.f32.mrf.mxu0  ;;  %v722_v6 = vpop.f32.mrf.mxu1 }
 0x4ea   :  { %v696_v7 = vadd.f32 %v825_v1, %v695_v3  ;;  %v723_v8 = vadd.f32 %v826_v2, %v722_v6 }
 0x4ec   :  { %v729_v11 = vmul.f32 %v728_v5, %v696_v7  ;;  %v725_v12 = vmax.f32 %v723_v8, 0.0 }
 0x4ee   :  { %v730_v13 = vadd.f32 %v729_v11, %v727_v10  ;;  %v732_v14 = vmul.f32 %v731_v9, %v725_v12 }
 0x4f0   :  { %v733_v15 = vadd.f32 %v732_v14, %v730_v13 }
 0x4f2   :  { %735 = vst.msk [vmem:[#allocation13] sm:$0x3] %vm734_vm1, %v733_v15 }
 0x4f3   :  { %746 = dma.vmem_to_hbm [thread:$0]  %s742_s1, 32, %s744_s5, [#allocation4]  }
 0x4f4   :  { %991 = dma.done.wait [#allocation4], 32  }
 0x4f5   :  { %992 = vsyncadd [#allocation4], 4294967264 }
 0x4f6   :  { %751 = vsyncpa [#allocation3], 1 }
 0x4f7   :  { %752 = vsyncpa [#allocation8], 1 }
 0x4f8   :  { %753 = vsyncpa [#allocation11], 1 }
 0x4f9   :  { %754 = vsyncpa [#allocation4], 1 }
 0x4fa   :  { %755 = vsyncpa [#allocation5], 1 }

</bundles_post_ra>
